<compile_context>
chip_gen: v7x
topology: tpu7x:2x2x1
jax: 0.10.0
libtpu: 0.0.40
codegen_flags: <defaults>
</compile_context>

<pallas_src>
import jax
import jax.numpy as jnp
from jax.experimental import pallas as pl
from jax.experimental.pallas import tpu as pltpu


def _round_up(a, b):
    return (a + b - 1) // b * b


def _cdiv(a, b):
    return -(-a // b)


# ---------------------------------------------------------------------------
# Kernels
# ---------------------------------------------------------------------------
def _fc_proj_kernel(x_ref, w0_ref, c0_ref, w1_ref, h_ref, g1_ref):
    """h = relu(x @ W0' + c0)  (bf16 residual anchor);   g1 = h @ W1''."""
    h = jnp.dot(x_ref[...], w0_ref[...], preferred_element_type=jnp.float32)
    h = jnp.maximum(h + c0_ref[...], 0.0)
    hb = h.astype(jnp.bfloat16)
    h_ref[...] = hb
    g1_ref[...] = jnp.dot(hb, w1_ref[...],
                          preferred_element_type=jnp.float32).astype(jnp.bfloat16)


def _prop_proj_kernel(a_ref, g_ref, last_ref, c_ref, wn_ref, gn_ref, acc_ref):
    """acc += A_int8[i,k] @ g[k]; at last k: h1 = relu(acc + c) + last; g_next = h1 @ Wn''."""
    k = pl.program_id(1)

    @pl.when(k == 0)
    def _():
        acc_ref[...] = jnp.zeros_like(acc_ref)

    # int8 A tile -> bf16 (the dequant scale was folded into the W that produced g)
    acc_ref[...] += jnp.dot(a_ref[...].astype(jnp.bfloat16), g_ref[...],
                            preferred_element_type=jnp.float32)

    @pl.when(k == pl.num_programs(1) - 1)
    def _():
        h1 = (jnp.maximum(acc_ref[...] + c_ref[...], 0.0)
              + last_ref[...].astype(jnp.float32))
        gn_ref[...] = jnp.dot(h1.astype(jnp.bfloat16), wn_ref[...],
                              preferred_element_type=jnp.float32).astype(jnp.bfloat16)


def _prop_final_kernel(a_ref, g_ref, last_ref, c_ref, o_ref, acc_ref):
    """acc += A_int8[i,k] @ g[k]; at last k: out = relu(acc + c) + last."""
    k = pl.program_id(1)

    @pl.when(k == 0)
    def _():
        acc_ref[...] = jnp.zeros_like(acc_ref)

    acc_ref[...] += jnp.dot(a_ref[...].astype(jnp.bfloat16), g_ref[...],
                            preferred_element_type=jnp.float32)

    @pl.when(k == pl.num_programs(1) - 1)
    def _():
        o_ref[...] = (jnp.maximum(acc_ref[...] + c_ref[...], 0.0)
                      + last_ref[...].astype(jnp.float32)).astype(o_ref.dtype)


# ---------------------------------------------------------------------------
# Wrapper: BN fold + int8 quantization of A_hat + padding + 3 pallas_calls
# ---------------------------------------------------------------------------
def sgformer_forward(x, a_hat, params, *, row_tile=512, col_tile=2048):
    N, in_ch = x.shape
    hid = params["w0"].shape[1]

    h_pad = _round_up(hid, 128)
    in_pad = _round_up(in_ch, 128)

    # ---- tile selection -----------------------------------------------------
    base = _round_up(N, 128)
    tn = min(_round_up(max(row_tile, 128), 128), base)     # row (sublane) tile
    n_row = _cdiv(base, tn)
    # v7x: keep the "parallel" row axis even so both TensorCores get work
    # (best effort; falls back to the original tn if no even split exists).
    if n_row > 1 and (n_row % 2):
        for cand in range(tn, 127, -128):
            if _cdiv(base, cand) % 2 == 0:
                tn = cand
                n_row = _cdiv(base, tn)
                break
    n_pad = n_row * tn

    # contraction (A_hat column / k-axis) tile: a multiple of tn that divides n_pad
    m_max = max(1, min(_round_up(max(col_tile, 128), 128) // tn, n_row))
    m = 1
    for cand in range(m_max, 0, -1):
        if n_row % cand == 0:
            m = cand
            break
    tk = m * tn
    n_col = n_pad // tk

    # ---- exact BN fold (done once, on the host) -----------------------------
    def fold(w, b, s, t):
        return w * s, b * s + t

    w0f, c0 = fold(params["w0"], params["b0"], params["s0"], params["t0"])
    w1f, c1 = fold(params["w1"], params["b1"], params["s1"], params["t1"])
    w2f, c2 = fold(params["w2"], params["b2"], params["s2"], params["t2"])

    # ---- int8 quantization of A_hat (single global scale, folded into W1/W2) --
    a_absmax = jnp.maximum(jnp.max(jnp.abs(a_hat)), 1e-12)
    a_scale = a_absmax / 127.0
    a_q = jnp.clip(jnp.round(a_hat / a_scale), -127, 127).astype(jnp.int8)

    bf16, f32 = jnp.bfloat16, jnp.float32

    def pad2(a, rows, cols, dtype):
        return jnp.pad(a, ((0, rows - a.shape[0]), (0, cols - a.shape[1]))).astype(dtype)

    xp = pad2(x, n_pad, in_pad, bf16)
    ap = pad2(a_q, n_pad, n_pad, jnp.int8)
    w0p = pad2(w0f, in_pad, h_pad, bf16)
    w1p = pad2(w1f * a_scale, h_pad, h_pad, bf16)   # a_scale folded in
    w2p = pad2(w2f * a_scale, h_pad, h_pad, bf16)   # a_scale folded in
    c0p = pad2(c0, 1, h_pad, f32)
    c1p = pad2(c1, 1, h_pad, f32)
    c2p = pad2(c2, 1, h_pad, f32)

    # ---- scoped-VMEM budget (covers v5e's 16 MiB default with big tiles) ------
    vmem_est = (2 * (tn * tk * 1            # int8 A tile, double buffered
                     + tk * h_pad * 2       # g tile (bf16)
                     + tn * h_pad * 2       # residual tile (bf16)
                     + h_pad * h_pad * 2    # weight (bf16)
                     + h_pad * 4)           # bias (f32)
                + 2 * tn * h_pad * 4        # output, double buffered (<= f32)
                + tn * h_pad * 4)           # f32 accumulator scratch
    vmem_limit = int(min(max(2 * vmem_est, 32 * 1024 * 1024), 60 * 1024 * 1024))

    cp_1d = pltpu.CompilerParams(dimension_semantics=("parallel",),
                                 vmem_limit_bytes=vmem_limit)
    cp_2d = pltpu.CompilerParams(dimension_semantics=("parallel", "arbitrary"),
                                 vmem_limit_bytes=vmem_limit)

    # ---- call 1: h = relu(x @ W0' + c0);  g1 = h @ W1'' -----------------------
    h, g1 = pl.pallas_call(
        _fc_proj_kernel,
        grid=(n_row,),
        in_specs=[
            pl.BlockSpec((tn, in_pad), lambda i: (i, 0)),
            pl.BlockSpec((in_pad, h_pad), lambda i: (0, 0)),
            pl.BlockSpec((1, h_pad), lambda i: (0, 0)),
            pl.BlockSpec((h_pad, h_pad), lambda i: (0, 0)),
        ],
        out_specs=[
            pl.BlockSpec((tn, h_pad), lambda i: (i, 0)),
            pl.BlockSpec((tn, h_pad), lambda i: (i, 0)),
        ],
        out_shape=[
            jax.ShapeDtypeStruct((n_pad, h_pad), bf16),   # residual anchor (bf16)
            jax.ShapeDtypeStruct((n_pad, h_pad), bf16),   # g1 = h @ W1''
        ],
        compiler_params=cp_1d,
    )(xp, w0p, c0p, w1p)

    # ---- call 2: g2 = (relu(A @ g1 + c1) + h) @ W2'' --------------------------
    g2 = pl.pallas_call(
        _prop_proj_kernel,
        grid=(n_row, n_col),
        in_specs=[
            pl.BlockSpec((tn, tk), lambda i, k: (i, k)),
            pl.BlockSpec((tk, h_pad), lambda i, k: (k, 0)),
            pl.BlockSpec((tn, h_pad), lambda i, k: (i, 0)),
            pl.BlockSpec((1, h_pad), lambda i, k: (0, 0)),
            pl.BlockSpec((h_pad, h_pad), lambda i, k: (0, 0)),
        ],
        out_specs=pl.BlockSpec((tn, h_pad), lambda i, k: (i, 0)),
        out_shape=jax.ShapeDtypeStruct((n_pad, h_pad), bf16),
        scratch_shapes=[pltpu.VMEM((tn, h_pad), f32)],
        compiler_params=cp_2d,
    )(ap, g1, h, c1p, w2p)

    # ---- call 3: out = relu(A @ g2 + c2) + h ----------------------------------
    out = pl.pallas_call(
        _prop_final_kernel,
        grid=(n_row, n_col),
        in_specs=[
            pl.BlockSpec((tn, tk), lambda i, k: (i, k)),
            pl.BlockSpec((tk, h_pad), lambda i, k: (k, 0)),
            pl.BlockSpec((tn, h_pad), lambda i, k: (i, 0)),
            pl.BlockSpec((1, h_pad), lambda i, k: (0, 0)),
        ],
        out_specs=pl.BlockSpec((tn, h_pad), lambda i, k: (i, 0)),
        out_shape=jax.ShapeDtypeStruct((n_pad, h_pad), f32),
        scratch_shapes=[pltpu.VMEM((tn, h_pad), f32)],
        compiler_params=cp_2d,
    )(ap, g2, h, c2p)

    return out[:N, :hid]


# ---------------------------------------------------------------------------
# Glue: densify PyG gcn_norm(A + I) into A_hat[dst, src] = deg^-1/2 * deg^-1/2
# (matches gcn_norm with flow="source_to_target": degrees over dst/col).
# ---------------------------------------------------------------------------
def gcn_dense_adj(edge_index, num_nodes):
    row, col = edge_index[0], edge_index[1]          # (src, dst)
    loop = jnp.arange(num_nodes, dtype=edge_index.dtype)
    row = jnp.concatenate([row, loop])
    col = jnp.concatenate([col, loop])
    ew = jnp.ones(row.shape[0], jnp.float32)
    deg = jnp.zeros((num_nodes,), jnp.float32).at[col].add(ew)
    dinv = jnp.where(deg > 0, 1.0 / jnp.sqrt(deg), 0.0)
    norm = dinv[row] * ew * dinv[col]
    # out[dst] = sum_{edges src->dst} norm * x[src]  =>  A_hat[dst, src] += norm
    a_hat = jnp.zeros((num_nodes, num_nodes), jnp.float32).at[col, row].add(norm)
    return a_hat


def fold_bn(gamma, beta, running_mean, running_var, eps=1e-5):
    scale = gamma / jnp.sqrt(running_var + eps)
    shift = beta - running_mean * scale
    return scale[None, :], shift[None, :]


# ---------------------------------------------------------------------------
# Pure-JAX f32 reference (unfolded params, full-precision A_hat)
# ---------------------------------------------------------------------------
def reference(x, a_hat, p):
    h = x @ p["w0"] + p["b0"]
    h = jnp.maximum(h * p["s0"] + p["t0"], 0.0)
    last = h
    h1 = a_hat @ (h @ p["w1"]) + p["b1"]
    h1 = jnp.maximum(h1 * p["s1"] + p["t1"], 0.0) + last
    h2 = a_hat @ (h1 @ p["w2"]) + p["b2"]
    h2 = jnp.maximum(h2 * p["s2"] + p["t2"], 0.0) + last
    return h2


if __name__ == "__main__":
    N = 64            # number of graph nodes
    IN_CH = 16        # in_channels
    HID = 32          # hidden_channels
    E = 256           # number of (directed) edges

    key = jax.random.PRNGKey(0)
    keys = jax.random.split(key, 16)

    # node features and a random edge_index
    x = jax.random.normal(keys[0], (N, IN_CH), jnp.float32)
    src = jax.random.randint(keys[1], (E,), 0, N, jnp.int32)
    dst = jax.random.randint(keys[2], (E,), 0, N, jnp.int32)
    edge_index = jnp.stack([src, dst], axis=0)
    a_hat = gcn_dense_adj(edge_index, N)

    def lin_init(k, fan_in, fan_out):
        bound = 1.0 / jnp.sqrt(fan_in)
        kw, kb = jax.random.split(k)
        w = jax.random.uniform(kw, (fan_in, fan_out), jnp.float32, -bound, bound)
        b = jax.random.uniform(kb, (1, fan_out), jnp.float32, -bound, bound)
        return w, b

    # fc[0]: Linear(in_channels, hidden); GCNConv lins (hidden -> hidden) + bias
    w0, b0 = lin_init(keys[3], IN_CH, HID)
    w1, b1 = lin_init(keys[4], HID, HID)
    w2, b2 = lin_init(keys[5], HID, HID)

    # BatchNorm1d params (deterministic, non-trivial running stats), folded.
    def bn_params(k):
        k1, k2, k3, k4 = jax.random.split(k, 4)
        gamma = 1.0 + 0.1 * jax.random.normal(k1, (HID,), jnp.float32)
        beta = 0.1 * jax.random.normal(k2, (HID,), jnp.float32)
        rmean = 0.1 * jax.random.normal(k3, (HID,), jnp.float32)
        rvar = jnp.abs(1.0 + 0.1 * jax.random.normal(k4, (HID,), jnp.float32))
        return fold_bn(gamma, beta, rmean, rvar)

    s0, t0 = bn_params(keys[6])
    s1, t1 = bn_params(keys[7])
    s2, t2 = bn_params(keys[8])

    params = dict(w0=w0, b0=b0, s0=s0, t0=t0,
                  w1=w1, b1=b1, s1=s1, t1=t1,
                  w2=w2, b2=b2, s2=s2, t2=t2)

    out = sgformer_forward(x, a_hat, params)
    out = jax.block_until_ready(out)

    ref = reference(x, a_hat, params)
    assert out.shape == (N, HID)
    # bf16 matmul operands + int8 A_hat (single global scale) with f32 accumulation
    # -> looser tolerance vs the f32 reference
    assert jnp.allclose(out, ref, atol=5e-2, rtol=5e-2), "mismatch vs JAX reference"

    print("KERNEL_OK")
</pallas_src>

<mosaic_0001>
module attributes {stable_mosaic.version = 11 : i64} {
  func.func @_fc_proj_kernel(%arg0: i32, %arg1: memref<128x128xbf16, #tpu.memory_space<vmem>>, %arg2: memref<128x128xbf16, #tpu.memory_space<vmem>>, %arg3: memref<1x128xf32, #tpu.memory_space<vmem>>, %arg4: memref<128x128xbf16, #tpu.memory_space<vmem>>, %arg5: memref<128x128xbf16, #tpu.memory_space<vmem>>, %arg6: memref<128x128xbf16, #tpu.memory_space<vmem>>) attributes {dimension_semantics = [#tpu.dimension_semantics<parallel>], iteration_bounds = array<i64: 1>, scalar_prefetch = 0 : i64, scratch_operands = 0 : i64, tpu.core_type = #tpu.core_type<tc>, window_params = [{transform_indices = @transform_0, window_bounds = array<i64: 128, 128>}, {pipeline_mode = #tpu.pipeline_mode<synchronous>, transform_indices = @transform_1, window_bounds = array<i64: 128, 128>}, {pipeline_mode = #tpu.pipeline_mode<synchronous>, transform_indices = @transform_2, window_bounds = array<i64: 1, 128>}, {pipeline_mode = #tpu.pipeline_mode<synchronous>, transform_indices = @transform_3, window_bounds = array<i64: 128, 128>}, {transform_indices = @transform_4, window_bounds = array<i64: 128, 128>}, {transform_indices = @transform_5, window_bounds = array<i64: 128, 128>}]} {
    %c0 = arith.constant 0 : index
    %c0_0 = arith.constant 0 : index
    %0 = vector.load %arg1[%c0, %c0_0] : memref<128x128xbf16, #tpu.memory_space<vmem>>, vector<128x128xbf16>
    %c0_1 = arith.constant 0 : index
    %c0_2 = arith.constant 0 : index
    %1 = vector.load %arg2[%c0_1, %c0_2] : memref<128x128xbf16, #tpu.memory_space<vmem>>, vector<128x128xbf16>
    %cst = arith.constant dense<0.000000e+00> : vector<128x128xf32>
    %2 = tpu.matmul %0, %1, %cst {dimension_numbers = #tpu.dot_dimension_numbers<[1], [0], [0], [1], [0, 0, 1, 1], [], []>} : vector<128x128xbf16>, vector<128x128xbf16>, vector<128x128xf32> -> vector<128x128xf32>
    %c0_3 = arith.constant 0 : index
    %c0_4 = arith.constant 0 : index
    %3 = vector.load %arg3[%c0_3, %c0_4] : memref<1x128xf32, #tpu.memory_space<vmem>>, vector<1x128xf32>
    %4 = vector.broadcast %3 : vector<1x128xf32> to vector<128x128xf32>
    %5 = arith.addf %2, %4 : vector<128x128xf32>
    %cst_5 = arith.constant 0.000000e+00 : f32
    %6 = vector.broadcast %cst_5 : f32 to vector<128x128xf32>
    %7 = arith.maximumf %5, %6 : vector<128x128xf32>
    %8 = arith.truncf %7 : vector<128x128xf32> to vector<128x128xbf16>
    %c0_6 = arith.constant 0 : index
    %c0_7 = arith.constant 0 : index
    %9 = vector.load %arg5[%c0_6, %c0_7] : memref<128x128xbf16, #tpu.memory_space<vmem>>, vector<128x128xbf16>
    tpu.vector_store %arg5[%c0_6, %c0_7], %8 {strides = array<i32>} : memref<128x128xbf16, #tpu.memory_space<vmem>>, vector<128x128xbf16>,
    %c0_8 = arith.constant 0 : index
    %c0_9 = arith.constant 0 : index
    %10 = vector.load %arg4[%c0_8, %c0_9] : memref<128x128xbf16, #tpu.memory_space<vmem>>, vector<128x128xbf16>
    %cst_10 = arith.constant dense<0.000000e+00> : vector<128x128xf32>
    %11 = tpu.matmul %8, %10, %cst_10 {dimension_numbers = #tpu.dot_dimension_numbers<[1], [0], [0], [1], [0, 0, 1, 1], [], []>} : vector<128x128xbf16>, vector<128x128xbf16>, vector<128x128xf32> -> vector<128x128xf32>
    %12 = arith.truncf %11 : vector<128x128xf32> to vector<128x128xbf16>
    %c0_11 = arith.constant 0 : index
    %c0_12 = arith.constant 0 : index
    %13 = vector.load %arg6[%c0_11, %c0_12] : memref<128x128xbf16, #tpu.memory_space<vmem>>, vector<128x128xbf16>
    tpu.vector_store %arg6[%c0_11, %c0_12], %12 {strides = array<i32>} : memref<128x128xbf16, #tpu.memory_space<vmem>>, vector<128x128xbf16>,
    return
  }
  func.func @transform_0(%arg0: i32) -> (i32, i32) {
    %c0_i32 = arith.constant 0 : i32
    %c0_i32_0 = arith.constant 0 : i32
    return %arg0, %c0_i32 : i32, i32
  }
  func.func @transform_1(%arg0: i32) -> (i32, i32) {
    %c0_i32 = arith.constant 0 : i32
    %c0_i32_0 = arith.constant 0 : i32
    %c0_i32_1 = arith.constant 0 : i32
    return %c0_i32, %c0_i32_0 : i32, i32
  }
  func.func @transform_2(%arg0: i32) -> (i32, i32) {
    %c0_i32 = arith.constant 0 : i32
    %c0_i32_0 = arith.constant 0 : i32
    %c0_i32_1 = arith.constant 0 : i32
    return %c0_i32, %c0_i32_0 : i32, i32
  }
  func.func @transform_3(%arg0: i32) -> (i32, i32) {
    %c0_i32 = arith.constant 0 : i32
    %c0_i32_0 = arith.constant 0 : i32
    %c0_i32_1 = arith.constant 0 : i32
    return %c0_i32, %c0_i32_0 : i32, i32
  }
  func.func @transform_4(%arg0: i32) -> (i32, i32) {
    %c0_i32 = arith.constant 0 : i32
    %c0_i32_0 = arith.constant 0 : i32
    return %arg0, %c0_i32 : i32, i32
  }
  func.func @transform_5(%arg0: i32) -> (i32, i32) {
    %c0_i32 = arith.constant 0 : i32
    %c0_i32_0 = arith.constant 0 : i32
    return %arg0, %c0_i32 : i32, i32
  }
}

</mosaic_0001>

<bundles_post_ra>
// kernel: tpu_custom_call.1
= control target key start
LH: loop header
LB: loop body
LE: loop exit
PB: predicated region body
PF: predicated region fallthrough
CT: control target
= control target key end

     0   :  { %11 = vsyncpa [#allocation3], 0  ;;  %s1216_s0 = inlined_call_operand.hbm [shape: bf16[128,128], index: 0, kind: input, shape index: {}]   ;;  %s1217_s1 = inlined_call_operand.hbm [shape: bf16[128,128], index: 1, kind: input, shape index: {}]   ;;  %s1218_s2 = inlined_call_operand.vmem [shape: f32[1,128], index: 2, kind: input, shape index: {}]   ;;  %s1219_s3 = inlined_call_operand.hbm [shape: bf16[128,128], index: 3, kind: input, shape index: {}]   ;;  %s1220_s4 = inlined_call_operand.hbm [shape: bf16[128,128], index: 4, kind: output, shape index: {0}]   ;;  %s1221_s5 = inlined_call_operand.hbm [shape: bf16[128,128], index: 5, kind: output, shape index: {1}]  }
   0x1   :  { %12 = vsyncpa [#allocation6], 0 }
   0x2   :  { %13 = vsyncpa [#allocation4], 0 }
   0x3   :  { %14 = vsyncpa [#allocation10], 0  ;;  %s1094_s18 = smov [#allocation5]   ;;  %s1095_s20 = smov [#allocation2]  }
   0x4   :  { %s32_s19 = sshll.u32 %s1094_s18, 4  ;;  %s20_s21 = sshll.u32 %s1095_s20, 4  ;;  %s33_s19 = int_to_ptr.vmem [resolvable:$true] %s32_s19  ;;  %s1131_s21 = int_to_ptr.vmem [resolvable:$true] %s20_s21 }
   0x5   :  { %s976_s24 = scalar_lea.hbm %s1217_s1, 1024 }
   0x6   :  { %p977_p0 = scmp.ne.s32.totalorder %s1217_s1, %s976_s24  ;;  %p980_p1 = scmp.lt.u32.totalorder %s976_s24, %s1217_s1 }
   0x8   :  { %p982_p2 = pnand %p980_p1, %p977_p0 }
   0xa   :  { %985 = shalt.err (!%p982_p2)
}
   0xb   :  { %s986_s29 = scalar_lea.vmem %s33_s19, 1024  ;;  %p991_p4 = scmp.lt.s32.totalorder %s33_s19, %s33_s19 }
   0xc   :  { %p987_p3 = scmp.ne.s32.totalorder %s33_s19, %s986_s29  ;;  %p992_p5 = scmp.lt.s32.totalorder %s986_s29, %s986_s29 }
   0xe   :  { %p993_p6 = por %p992_p5, %p991_p4 }
  0x10   :  { %p994_p7 = pnand %p993_p6, %p987_p3 }
  0x12   :  { %997 = shalt.err (!%p994_p7)
}
  0x13   :  { %s1096_s30 = smov 64   ;;  %s1097_s6 = smov 4  }
  0x14   :  { %38 = dma.hbm_to_vmem [thread:$0]  %s1217_s1, 1024, %s33_s19, [#allocation6], %s1096_s30, %s1096_s30, %s1097_s6  }
  0x15   :  { %s998_s11 = scalar_lea.hbm %s1216_s0, 1024 }
  0x16   :  { %p999_p8 = scmp.ne.s32.totalorder %s1216_s0, %s998_s11  ;;  %p1002_p9 = scmp.lt.u32.totalorder %s998_s11, %s1216_s0 }
  0x18   :  { %p1004_p10 = pnand %p1002_p9, %p999_p8 }
  0x1a   :  { %1007 = shalt.err (!%p1004_p10)
}
  0x1b   :  { %s1008_s16 = scalar_lea.vmem %s1131_s21, 1024  ;;  %p1013_p12 = scmp.lt.s32.totalorder %s1131_s21, %s1131_s21 }
  0x1c   :  { %p1009_p11 = scmp.ne.s32.totalorder %s1131_s21, %s1008_s16  ;;  %p1014_p13 = scmp.lt.s32.totalorder %s1008_s16, %s1008_s16 }
  0x1e   :  { %p1015_p0 = por %p1014_p13, %p1013_p12 }
  0x20   :  { %p1016_p1 = pnand %p1015_p0, %p1009_p11 }
  0x22   :  { %1019 = shalt.err (!%p1016_p1)
}
  0x23   :  { %26 = dma.hbm_to_vmem [thread:$0]  %s1216_s0, 1024, %s1131_s21, [#allocation3], %s1096_s30, %s1096_s30, %s1097_s6  }
  0x24   :  { %s1098_s18 = smov [#allocation7]   ;;  %s1020_s23 = scalar_lea.hbm %s1219_s3, 1024 }
  0x25   :  { %s46_s19 = sshll.u32 %s1098_s18, 4  ;;  %p1021_p2 = scmp.ne.s32.totalorder %s1219_s3, %s1020_s23  ;;  %s47_s19 = int_to_ptr.vmem [resolvable:$true] %s46_s19 }
  0x26   :  { %p1024_p3 = scmp.lt.u32.totalorder %s1020_s23, %s1219_s3 }
  0x28   :  { %p1026_p4 = pnand %p1024_p3, %p1021_p2 }
  0x2a   :  { %1029 = shalt.err (!%p1026_p4)
}
  0x2b   :  { %s1030_s28 = scalar_lea.vmem %s47_s19, 1024  ;;  %p1035_p6 = scmp.lt.s32.totalorder %s47_s19, %s47_s19 }
  0x2c   :  { %p1031_p5 = scmp.ne.s32.totalorder %s47_s19, %s1030_s28  ;;  %p1036_p7 = scmp.lt.s32.totalorder %s1030_s28, %s1030_s28 }
  0x2e   :  { %p1037_p8 = por %p1036_p7, %p1035_p6 }
  0x30   :  { %p1038_p9 = pnand %p1037_p8, %p1031_p5 }
  0x32   :  { %1041 = shalt.err (!%p1038_p9)
}
  0x33   :  { %52 = dma.hbm_to_vmem [thread:$0]  %s1219_s3, 1024, %s47_s19, [#allocation6], %s1096_s30, %s1096_s30, %s1097_s6  }
  0x34   :  { %1086 = dma.done.wait [#allocation3], 1024  }
  0x35   :  { %1087 = vsyncadd [#allocation3], 4294966272 }
  0x36   :  { %1088 = dma.done.wait [#allocation6], 2048  }
  0x37   :  { %1089 = vsyncadd [#allocation6], 4294965248  ;;  %v952_v0 = vld [vmem:[#allocation5] sm:$0xff]   ;;  %v953_v1 = vld [vmem:[#allocation5 + $0x8] sm:$0xff]  }
  0x38   :  { %881 = vmatprep.subr.bf16.mxu0 %v952_v0  ;;  %v954_v2 = vld [vmem:[#allocation5 + $0x10] sm:$0xff]   ;;  %v955_v3 = vld [vmem:[#allocation5 + $0x18] sm:$0xff]   ;;  %v960_v4 = vld [vmem:[#allocation2] sm:$0xff]  }
  0x39   :  { %882 = vmatpush3.bf16.msra.mxu0 %v952_v0  ;;  %897 = vmatprep.mubr.bf16.mxu0 %v960_v4  ;;  %v956_v5 = vld [vmem:[#allocation5 + $0x20] sm:$0xff]   ;;  %v957_v6 = vld [vmem:[#allocation5 + $0x28] sm:$0xff]   ;;  %v958_v9 = vld [vmem:[#allocation5 + $0x30] sm:$0xff]  }
  0x3a   :  { %883 = vmatprep.subr.bf16.mxu0 %v953_v1  ;;  %v968_v7 = vld [vmem:[#allocation7] sm:$0xff]   ;;  %v969_v8 = vld [vmem:[#allocation7 + $0x8] sm:$0xff]   ;;  %v970_v10 = vld [vmem:[#allocation7 + $0x10] sm:$0xff]  }
  0x3b   :  { %913 = vmatprep.subr.bf16.mxu1 %v968_v7  ;;  %v959_v11 = vld [vmem:[#allocation5 + $0x38] sm:$0xff]   ;;  %v972_v13 = vld [vmem:[#allocation7 + $0x20] sm:$0xff]   ;;  %v961_v14 = vld [vmem:[#allocation2 + $0x8] sm:$0xff]  }
  0x3c   :  { %914 = vmatpush3.bf16.msra.mxu1 %v968_v7  ;;  %v971_v12 = vld [vmem:[#allocation7 + $0x18] sm:$0xff]   ;;  %v962_v15 = vld [vmem:[#allocation2 + $0x10] sm:$0xff]   ;;  %v973_v16 = vld [vmem:[#allocation7 + $0x28] sm:$0xff]  }
  0x3d   :  { %884 = vmatpush3.bf16.msra.mxu0 %v953_v1  ;;  %915 = vmatprep.subr.bf16.mxu1 %v969_v8  ;;  %v963_v17 = vld [vmem:[#allocation2 + $0x18] sm:$0xff]   ;;  %v964_v18 = vld [vmem:[#allocation2 + $0x20] sm:$0xff]   ;;  %v965_v19 = vld [vmem:[#allocation2 + $0x28] sm:$0xff]  }
  0x3e   :  { %885 = vmatprep.subr.bf16.mxu0 %v954_v2  ;;  %v966_v20 = vld [vmem:[#allocation2 + $0x30] sm:$0xff]   ;;  %v967_v21 = vld [vmem:[#allocation2 + $0x38] sm:$0xff]   ;;  %v666_v24 = vld [vmem:[%s1218_s2] ss:$0 sm:$0xff]  ;;  %s1099_s2 = smov [#allocation8]  }
  0x3f   :  { %v974_v22 = vld [vmem:[#allocation7 + $0x30] sm:$0xff]   ;;  %v975_v23 = vld [vmem:[#allocation7 + $0x38] sm:$0xff]   ;;  %s637_s7 = sshll.u32 %s1099_s2, 4  ;;  %s638_s7 = int_to_ptr.vmem [resolvable:$true] %s637_s7 }
  0x40   :  { %916 = vmatpush3.bf16.msra.mxu1 %v969_v8  ;;  %s1042_s8 = scalar_lea.vmem %s638_s7, 1024  ;;  %p1047_p11 = scmp.lt.s32.totalorder %s638_s7, %s638_s7 }
  0x41   :  { %886 = vmatpush3.bf16.msra.mxu0 %v954_v2  ;;  %917 = vmatprep.subr.bf16.mxu1 %v970_v10  ;;  %p1043_p10 = scmp.ne.s32.totalorder %s638_s7, %s1042_s8  ;;  %p1048_p12 = scmp.lt.s32.totalorder %s1042_s8, %s1042_s8 }
  0x42   :  { %887 = vmatprep.subr.bf16.mxu0 %v955_v3 }
  0x43   :  { %p1049_p13 = por %p1048_p12, %p1047_p11 }
  0x44   :  { %918 = vmatpush3.bf16.msra.mxu1 %v970_v10 }
  0x45   :  { %888 = vmatpush3.bf16.msra.mxu0 %v955_v3  ;;  %919 = vmatprep.subr.bf16.mxu1 %v971_v12  ;;  %p1050_p0 = pnand %p1049_p13, %p1043_p10 }
  0x46   :  { %889 = vmatprep.subr.bf16.mxu0 %v956_v5 }
  0x48   :  { %920 = vmatpush3.bf16.msra.mxu1 %v971_v12 }
  0x49   :  { %890 = vmatpush3.bf16.msra.mxu0 %v956_v5  ;;  %921 = vmatprep.subr.bf16.mxu1 %v972_v13 }
  0x4a   :  { %891 = vmatprep.subr.bf16.mxu0 %v957_v6 }
  0x4c   :  { %922 = vmatpush3.bf16.msra.mxu1 %v972_v13 }
  0x4d   :  { %892 = vmatpush3.bf16.msra.mxu0 %v957_v6  ;;  %923 = vmatprep.subr.bf16.mxu1 %v973_v16 }
  0x4e   :  { %893 = vmatprep.subr.bf16.mxu0 %v958_v9 }
  0x50   :  { %924 = vmatpush3.bf16.msra.mxu1 %v973_v16 }
  0x51   :  { %894 = vmatpush3.bf16.msra.mxu0 %v958_v9  ;;  %925 = vmatprep.subr.bf16.mxu1 %v974_v22 }
  0x52   :  { %895 = vmatprep.subr.bf16.mxu0 %v959_v11 }
  0x54   :  { %926 = vmatpush3.bf16.msra.mxu1 %v974_v22 }
  0x55   :  { %896 = vmatpush3.bf16.msra.mxu0 %v959_v11  ;;  %927 = vmatprep.subr.bf16.mxu1 %v975_v23 }
  0x58   :  { %898 = vmatmul.mubr.bf16.vlgmr.msra.gmra.mrb[0].mxu0 %v961_v14  ;;  %928 = vmatpush3.bf16.msra.mxu1 %v975_v23 }
  0x59   :  { %901 = vmatprep.mubr.bf16.mxu0 %v962_v15 }
  0x60   :  { %902 = vmatmul.mubr.bf16.gmra.mrb[4].mxu0 %v963_v17 }
  0x61   :  { %905 = vmatprep.mubr.bf16.mxu0 %v964_v18 }
  0x68   :  { %906 = vmatmul.mubr.bf16.gmra.mrb[8].mxu0 %v965_v19 }
  0x69   :  { %909 = vmatprep.mubr.bf16.mxu0 %v966_v20 }
  0x70   :  { %910 = vmatmul.mubr.bf16.gmra.mrb[12].mxu0 %v967_v21 }
 0x12b   :  { %v899_v25 = vpop.f32.mrb[0].mxu0 }
 0x12c   :  { %v241_v26 = vadd.f32 %v899_v25, %v666_v24  ;;  %v232_v27 = vpop.f32.mrb[1].mxu0 }
 0x12d   :  { %v233_v28 = vadd.f32 %v666_v24, %v232_v27  ;;  %v900_v29 = vpop.f32.mrb[2].mxu0 }
 0x12e   :  { %v244_v30 = vadd.f32 %v900_v29, %v666_v24  ;;  %v235_v31 = vpop.f32.mrb[3].mxu0  ;;  %v297_v33 = vmax.f32 %v241_v26, 0.0 }
 0x12f   :  { %v236_v32 = vadd.f32 %v666_v24, %v235_v31  ;;  %v295_v35 = vmax.f32 %v233_v28, 0.0 }
 0x130   :  { %v298_v34 = vmax.f32 %v244_v30, 0.0 }
 0x131   :  { %v296_v36 = vmax.f32 %v236_v32, 0.0 }
 0x132   :  { %v312_v37 = vpack.c.bf16 %v298_v34, %v297_v33 }
 0x133   :  { %v903_v38 = vpop.f32.mrb[4].mxu0  ;;  %v311_v39 = vpack.c.bf16 %v296_v36, %v295_v35 }
 0x134   :  { %835 = vst [vmem:[#allocation8 + $0x8] sm:$0xff] %v312_v37   ;;  %v257_v40 = vadd.f32 %v903_v38, %v666_v24  ;;  %v248_v41 = vpop.f32.mrb[5].mxu0 }
 0x135   :  { %v249_v42 = vadd.f32 %v666_v24, %v248_v41  ;;  %v904_v43 = vpop.f32.mrb[6].mxu0  ;;  %759 = vst [vmem:[#allocation8] sm:$0xff] %v311_v39   ;;  %929 = vmatprep.mubr.bf16.mxu1 %v311_v39 }
 0x136   :  { %v260_v44 = vadd.f32 %v904_v43, %v666_v24  ;;  %v251_v45 = vpop.f32.mrb[7].mxu0  ;;  %930 = vmatmul.mubr.bf16.vlgmr.msra.gmra.mrb[0].mxu1 %v312_v37  ;;  %v301_v47 = vmax.f32 %v257_v40, 0.0 }
 0x137   :  { %v252_v46 = vadd.f32 %v666_v24, %v251_v45  ;;  %v299_v49 = vmax.f32 %v249_v42, 0.0 }
 0x138   :  { %v302_v48 = vmax.f32 %v260_v44, 0.0 }
 0x139   :  { %v300_v50 = vmax.f32 %v252_v46, 0.0 }
 0x13a   :  { %v314_v51 = vpack.c.bf16 %v302_v48, %v301_v47 }
 0x13b   :  { %v313_v52 = vpack.c.bf16 %v300_v50, %v299_v49  ;;  %v907_v53 = vpop.f32.mrb[8].mxu0 }
 0x13c   :  { %837 = vst [vmem:[#allocation8 + $0x18] sm:$0xff] %v314_v51   ;;  %v273_v54 = vadd.f32 %v907_v53, %v666_v24  ;;  %v264_v55 = vpop.f32.mrb[9].mxu0 }
 0x13d   :  { %836 = vst [vmem:[#allocation8 + $0x10] sm:$0xff] %v313_v52   ;;  %v265_v56 = vadd.f32 %v666_v24, %v264_v55  ;;  %v908_v57 = vpop.f32.mrb[10].mxu0  ;;  %933 = vmatprep.mubr.bf16.mxu1 %v313_v52 }
 0x13e   :  { %v276_v58 = vadd.f32 %v908_v57, %v666_v24  ;;  %v267_v59 = vpop.f32.mrb[11].mxu0  ;;  %934 = vmatmul.mubr.bf16.gmra.mrb[4].mxu1 %v314_v51  ;;  %v305_v61 = vmax.f32 %v273_v54, 0.0 }
 0x13f   :  { %v268_v60 = vadd.f32 %v666_v24, %v267_v59  ;;  %v303_v63 = vmax.f32 %v265_v56, 0.0 }
 0x140   :  { %v306_v62 = vmax.f32 %v276_v58, 0.0 }
 0x141   :  { %v304_v0 = vmax.f32 %v268_v60, 0.0 }
 0x142   :  { %v316_v1 = vpack.c.bf16 %v306_v62, %v305_v61 }
 0x143   :  { %v315_v2 = vpack.c.bf16 %v304_v0, %v303_v63  ;;  %v911_v3 = vpop.f32.mrb[12].mxu0 }
 0x144   :  { %839 = vst [vmem:[#allocation8 + $0x28] sm:$0xff] %v316_v1   ;;  %v289_v4 = vadd.f32 %v911_v3, %v666_v24  ;;  %v280_v5 = vpop.f32.mrb[13].mxu0 }
 0x145   :  { %838 = vst [vmem:[#allocation8 + $0x20] sm:$0xff] %v315_v2   ;;  %v281_v6 = vadd.f32 %v666_v24, %v280_v5  ;;  %v912_v7 = vpop.f32.mrb[14].mxu0  ;;  %937 = vmatprep.mubr.bf16.mxu1 %v315_v2 }
 0x146   :  { %v292_v8 = vadd.f32 %v912_v7, %v666_v24  ;;  %v283_v9 = vpop.f32.mrb[15].mxu0  ;;  %938 = vmatmul.mubr.bf16.gmra.mrb[8].mxu1 %v316_v1  ;;  %v309_v11 = vmax.f32 %v289_v4, 0.0 }
 0x147   :  { %v284_v10 = vadd.f32 %v666_v24, %v283_v9  ;;  %v307_v13 = vmax.f32 %v281_v6, 0.0 }
 0x148   :  { %v310_v12 = vmax.f32 %v292_v8, 0.0 }
 0x149   :  { %v308_v14 = vmax.f32 %v284_v10, 0.0 }
 0x14a   :  { %v318_v15 = vpack.c.bf16 %v310_v12, %v309_v11 }
 0x14b   :  { %v317_v16 = vpack.c.bf16 %v308_v14, %v307_v13 }
 0x14c   :  { %841 = vst [vmem:[#allocation8 + $0x38] sm:$0xff] %v318_v15  }
 0x14d   :  { %840 = vst [vmem:[#allocation8 + $0x30] sm:$0xff] %v317_v16   ;;  %941 = vmatprep.mubr.bf16.mxu1 %v317_v16 }
 0x14e   :  { %942 = vmatmul.mubr.bf16.gmra.mrb[12].mxu1 %v318_v15 }
 0x14f   :  { %1053 = shalt.err (!%p1050_p0)
}
 0x150   :  { %s1054_s11 = scalar_lea.hbm %s1220_s4, 1024 }
 0x151   :  { %p1055_p1 = scmp.ne.s32.totalorder %s1220_s4, %s1054_s11  ;;  %p1058_p2 = scmp.lt.u32.totalorder %s1054_s11, %s1220_s4 }
 0x153   :  { %p1060_p3 = pnand %p1058_p2, %p1055_p1 }
 0x155   :  { %1063 = shalt.err (!%p1060_p3)
}
 0x156   :  { %643 = dma.vmem_to_hbm [thread:$0]  %s638_s7, 1024, %s1220_s4, [#allocation4], %s1096_s30, %s1096_s30, %s1097_s6  }
 0x157   :  { %s1100_s4 = smov [#allocation9]  }
 0x158   :  { %s649_s17 = sshll.u32 %s1100_s4, 4  ;;  %s650_s17 = int_to_ptr.vmem [resolvable:$true] %s649_s17 }
 0x159   :  { %s1064_s18 = scalar_lea.vmem %s650_s17, 1024  ;;  %p1069_p5 = scmp.lt.s32.totalorder %s650_s17, %s650_s17 }
 0x15a   :  { %p1065_p4 = scmp.ne.s32.totalorder %s650_s17, %s1064_s18  ;;  %p1070_p6 = scmp.lt.s32.totalorder %s1064_s18, %s1064_s18 }
 0x15c   :  { %p1071_p7 = por %p1070_p6, %p1069_p5 }
 0x15e   :  { %p1072_p8 = pnand %p1071_p7, %p1065_p4 }
 0x209   :  { %v931_v17 = vpop.f32.mrb[0].mxu1 }
 0x20a   :  { %v489_v18 = vpop.f32.mrb[1].mxu1 }
 0x20b   :  { %v932_v19 = vpop.f32.mrb[2].mxu1 }
 0x20c   :  { %v803_v20 = vpack.c.bf16 %v932_v19, %v931_v17  ;;  %v492_v21 = vpop.f32.mrb[3].mxu1 }
 0x20d   :  { %v798_v22 = vpack.c.bf16 %v492_v21, %v489_v18 }
 0x20e   :  { %842 = vst [vmem:[#allocation9 + $0x8] sm:$0xff] %v803_v20  }
 0x20f   :  { %799 = vst [vmem:[#allocation9] sm:$0xff] %v798_v22  }
 0x211   :  { %v935_v23 = vpop.f32.mrb[4].mxu1 }
 0x212   :  { %v505_v24 = vpop.f32.mrb[5].mxu1 }
 0x213   :  { %v936_v25 = vpop.f32.mrb[6].mxu1 }
 0x214   :  { %v813_v26 = vpack.c.bf16 %v936_v25, %v935_v23  ;;  %v508_v27 = vpop.f32.mrb[7].mxu1 }
 0x215   :  { %v808_v28 = vpack.c.bf16 %v508_v27, %v505_v24 }
 0x216   :  { %844 = vst [vmem:[#allocation9 + $0x18] sm:$0xff] %v813_v26  }
 0x217   :  { %843 = vst [vmem:[#allocation9 + $0x10] sm:$0xff] %v808_v28  }
 0x219   :  { %v939_v29 = vpop.f32.mrb[8].mxu1 }
 0x21a   :  { %v521_v30 = vpop.f32.mrb[9].mxu1 }
 0x21b   :  { %v940_v31 = vpop.f32.mrb[10].mxu1 }
 0x21c   :  { %v823_v32 = vpack.c.bf16 %v940_v31, %v939_v29  ;;  %v524_v33 = vpop.f32.mrb[11].mxu1 }
 0x21d   :  { %v818_v34 = vpack.c.bf16 %v524_v33, %v521_v30 }
 0x21e   :  { %846 = vst [vmem:[#allocation9 + $0x28] sm:$0xff] %v823_v32  }
 0x21f   :  { %845 = vst [vmem:[#allocation9 + $0x20] sm:$0xff] %v818_v34  }
 0x221   :  { %v943_v35 = vpop.f32.mrb[12].mxu1 }
 0x222   :  { %v537_v36 = vpop.f32.mrb[13].mxu1 }
 0x223   :  { %v944_v37 = vpop.f32.mrb[14].mxu1 }
 0x224   :  { %v833_v38 = vpack.c.bf16 %v944_v37, %v943_v35  ;;  %v540_v39 = vpop.f32.mrb[15].mxu1 }
 0x225   :  { %v828_v40 = vpack.c.bf16 %v540_v39, %v537_v36 }
 0x226   :  { %848 = vst [vmem:[#allocation9 + $0x38] sm:$0xff] %v833_v38  }
 0x227   :  { %847 = vst [vmem:[#allocation9 + $0x30] sm:$0xff] %v828_v40  }
 0x228   :  { %1075 = shalt.err (!%p1072_p8)
}
 0x229   :  { %s1076_s22 = scalar_lea.hbm %s1221_s5, 1024 }
 0x22a   :  { %p1077_p9 = scmp.ne.s32.totalorder %s1221_s5, %s1076_s22  ;;  %p1080_p10 = scmp.lt.u32.totalorder %s1076_s22, %s1221_s5 }
 0x22c   :  { %p1082_p11 = pnand %p1080_p10, %p1077_p9 }
 0x22e   :  { %1085 = shalt.err (!%p1082_p11)
}
 0x22f   :  { %655 = dma.vmem_to_hbm [thread:$0]  %s650_s17, 1024, %s1221_s5, [#allocation10], %s1096_s30, %s1096_s30, %s1097_s6  }
 0x230   :  { %1090 = dma.done.wait [#allocation4], 1024  }
 0x231   :  { %1091 = vsyncadd [#allocation4], 4294966272 }
 0x232   :  { %1092 = dma.done.wait [#allocation10], 1024  }
 0x233   :  { %1093 = vsyncadd [#allocation10], 4294966272 }
 0x234   :  { %662 = vsyncpa [#allocation3], 1 }
 0x235   :  { %663 = vsyncpa [#allocation6], 1 }
 0x236   :  { %664 = vsyncpa [#allocation4], 1 }
 0x237   :  { %665 = vsyncpa [#allocation10], 1 }

</bundles_post_ra>
